<compile_context>
chip_gen: v6e
topology: v6e:2x2x1
jax: 0.10.0
libtpu: 0.0.40
codegen_flags: <defaults>
</compile_context>

<pallas_src>
import numpy as np
import jax
import jax.numpy as jnp
from jax.experimental import pallas as pl
from jax.experimental.pallas import tpu as pltpu

L_IN = 130          # input sequence length -> x is (B, 1, 130)
L1 = L_IN - 2       # 128 after Conv1d(k=3)
P1 = 64             # AdaptiveMaxPool1d(64)
L2 = P1 - 2         # 62 after Conv1d(k=3)
P2 = 64             # AdaptiveMaxPool1d(64)
C1, C2 = 32, 64
FLAT = C2 * P2      # 4096
HID = 2048
TN = 1024           # hidden tile for the MLP kernel (bf16 weight tile = 8 MiB)
BT_MAX = 8          # samples per feature-kernel grid step


def _pool_select_mats(lin, lout):
    """One-hot (lin, lout) matrices selecting the first / last element of every
    PyTorch AdaptiveMaxPool1d window.  Exact whenever each window has <= 2 elems."""
    s0 = np.zeros((lin, lout), np.float32)
    s1 = np.zeros((lin, lout), np.float32)
    for i in range(lout):
        s = (i * lin) // lout                   # floor(i*Lin/Lout)
        e = -((-(i + 1) * lin) // lout)         # ceil((i+1)*Lin/Lout)
        assert 1 <= e - s <= 2, "selection pooling needs window size <= 2"
        s0[s, i] = 1.0
        s1[e - 1, i] = 1.0
    return jnp.asarray(s0), jnp.asarray(s1)


# ---------------- feature kernel: conv1 -> relu -> pool -> conv2 -> relu -> pool ---------

def _feature_kernel(x_ref, w1_ref, b1_ref, pe1_ref, po1_ref,
                    w2_ref, b2_ref, s0_ref, s1_ref, o_ref):
    bt = x_ref.shape[0]                                   # samples in this tile (static)
    x = x_ref[...][:, 0, :]                               # (BT, 130)

    # Conv1d(1, 32, k=3) + bias + ReLU, channels-first: (BT, 32, 128)
    w1 = w1_ref[...]                                      # (32, 3)
    h1 = (w1[None, :, 0:1] * x[:, None, 0:L1]
          + w1[None, :, 1:2] * x[:, None, 1:L1 + 1]
          + w1[None, :, 2:3] * x[:, None, 2:L1 + 2]
          + b1_ref[...][None, :, :])
    h1 = jnp.maximum(h1, 0.0)
    h1r = h1.reshape(bt * C1, L1)                         # (BT*32, 128)

    # AdaptiveMaxPool1d(64): 128 -> 64, windows [2i, 2i+2) -> max of even/odd selections
    p1 = jnp.maximum(
        jnp.dot(h1r, pe1_ref[...], preferred_element_type=jnp.float32),
        jnp.dot(h1r, po1_ref[...], preferred_element_type=jnp.float32))
    p1 = p1.reshape(bt, C1, P1)                           # (BT, 32, 64)

    # Conv1d(32, 64, k=3) + bias + ReLU: 3 taps fused into one (64,96)@(96,62) per sample
    w2f = w2_ref[...]                                     # (64, 96)
    b2 = b2_ref[...]                                      # (64, 1)
    h2_rows = []
    for b in range(bt):                                   # bt <= 8, unrolled
        a = jnp.concatenate(
            [p1[b, :, 0:L2], p1[b, :, 1:L2 + 1], p1[b, :, 2:L2 + 2]], axis=0)  # (96, 62)
        h2_b = jnp.dot(w2f, a, preferred_element_type=jnp.float32) + b2        # (64, 62)
        h2_rows.append(jnp.maximum(h2_b, 0.0))
    h2 = jnp.concatenate(h2_rows, axis=0)                 # (BT*64, 62)

    # AdaptiveMaxPool1d(64): 62 -> 64, windows of size 1-2 -> max of two selections
    p2 = jnp.maximum(
        jnp.dot(h2, s0_ref[...], preferred_element_type=jnp.float32),
        jnp.dot(h2, s1_ref[...], preferred_element_type=jnp.float32))          # (BT*64, 64)

    o_ref[...] = p2                                       # rows are (sample, channel)-major


# ---------------- fused MLP kernel: Linear(4096,2048) + ReLU + Linear(2048,1) ------------

def _mlp_kernel(x_ref, w1_ref, b1_ref, w2_ref, b2_ref, o_ref):
    j = pl.program_id(0)
    # bf16 x bf16 -> f32 accumulation on the MXU
    h = jnp.dot(x_ref[...], w1_ref[...], preferred_element_type=jnp.float32) + b1_ref[...]
    h = jnp.maximum(h, 0.0)                               # (B, TN) f32
    # fc2 tile: weighted lane-reduce instead of an MXU matmul with N=1
    part = jnp.sum(h * w2_ref[...], axis=-1, keepdims=True)                    # (B, 1)

    @pl.when(j == 0)
    def _():
        o_ref[...] = jnp.zeros_like(o_ref)

    o_ref[...] += part

    @pl.when(j == pl.num_programs(0) - 1)
    def _():
        o_ref[...] += b2_ref[...]


# ---------------- wrapper -----------------------------------------------------------------

def active_cnn_forward(x, params):
    assert x.shape[1:] == (1, L_IN), x.shape
    B = x.shape[0]
    w1, b1, w2, b2, wf1, bf1, wf2, bf2 = params

    # batch tiling for the feature kernel
    BT = BT_MAX if B >= BT_MAX else B
    BP = ((B + BT - 1) // BT) * BT
    xp = x if BP == B else jnp.concatenate(
        [x, jnp.zeros((BP - B, 1, L_IN), x.dtype)], axis=0)
    num_tiles = BP // BT

    w1m = w1[:, 0, :]                                   # (32, 3)
    b1c = b1[:, None]                                   # (32, 1)
    w2f = jnp.transpose(w2, (0, 2, 1)).reshape(C2, 3 * C1)   # (64, 96): col = k*32 + cin
    b2c = b2[:, None]                                   # (64, 1)
    pe1, po1 = _pool_select_mats(L1, P1)                # (128, 64) each
    s0, s1 = _pool_select_mats(L2, P2)                  # (62, 64) each

    feats = pl.pallas_call(
        _feature_kernel,
        out_shape=jax.ShapeDtypeStruct((BP * C2, P2), jnp.float32),
        grid_spec=pltpu.PrefetchScalarGridSpec(
            num_scalar_prefetch=0,
            grid=(num_tiles,),
            in_specs=[
                pl.BlockSpec((BT, 1, L_IN), lambda b: (b, 0, 0)),
                pl.BlockSpec((C1, 3), lambda b: (0, 0)),
                pl.BlockSpec((C1, 1), lambda b: (0, 0)),
                pl.BlockSpec((L1, P1), lambda b: (0, 0)),
                pl.BlockSpec((L1, P1), lambda b: (0, 0)),
                pl.BlockSpec((C2, 3 * C1), lambda b: (0, 0)),
                pl.BlockSpec((C2, 1), lambda b: (0, 0)),
                pl.BlockSpec((L2, P2), lambda b: (0, 0)),
                pl.BlockSpec((L2, P2), lambda b: (0, 0)),
            ],
            out_specs=pl.BlockSpec((BT * C2, P2), lambda b: (b, 0)),
        ),
        compiler_params=pltpu.CompilerParams(
            dimension_semantics=("parallel",)),
    )(xp, w1m, b1c, pe1, po1, w2f, b2c, s0, s1)

    # row (b*64 + c), col l  ->  flat index c*64 + l : identical to torch.flatten order.
    flat = feats.reshape(BP, FLAT)[:B].astype(jnp.bfloat16)

    wf1t = wf1.T.astype(jnp.bfloat16)    # (4096, 2048) bf16 (HBM-bound stage)
    bf1r = bf1[None, :]                  # (1, 2048) f32
    wf2r = wf2                           # (1, 2048) f32
    bf2r = bf2[None, :]                  # (1, 1)    f32

    out = pl.pallas_call(
        _mlp_kernel,
        out_shape=jax.ShapeDtypeStruct((B, 1), jnp.float32),
        grid_spec=pltpu.PrefetchScalarGridSpec(
            num_scalar_prefetch=0,
            grid=(HID // TN,),
            in_specs=[
                pl.BlockSpec((B, FLAT), lambda j: (0, 0)),
                pl.BlockSpec((FLAT, TN), lambda j: (0, j)),
                pl.BlockSpec((1, TN), lambda j: (0, j)),
                pl.BlockSpec((1, TN), lambda j: (0, j)),
                pl.BlockSpec((1, 1), lambda j: (0, 0)),
            ],
            out_specs=pl.BlockSpec((B, 1), lambda j: (0, 0)),
        ),
        compiler_params=pltpu.CompilerParams(
            dimension_semantics=("arbitrary",),
            vmem_limit_bytes=48 << 20),   # <= v7x's 64 MiB physical VMEM
    )(flat, wf1t, bf1r, wf2r, bf2r)
    return out


# ---------------- deterministic parameter init (mirrors module __init__) -----------------

def init_params(key):
    ks = jax.random.split(key, 6)
    lim1 = float(np.sqrt(6.0 / (1 * 3 + 32 * 3)))
    w1 = jax.random.uniform(ks[0], (32, 1, 3), jnp.float32, -lim1, lim1)
    b1 = jnp.full((32,), 0.0003, jnp.float32)
    lim2 = float(np.sqrt(6.0 / (32 * 3 + 64 * 3)))
    w2 = jax.random.uniform(ks[1], (64, 32, 3), jnp.float32, -lim2, lim2)
    b2 = jnp.full((64,), 0.0003, jnp.float32)
    lf1 = 1.0 / np.sqrt(FLAT)
    wf1 = jax.random.uniform(ks[2], (HID, FLAT), jnp.float32, -lf1, lf1)
    bf1 = jax.random.uniform(ks[3], (HID,), jnp.float32, -lf1, lf1)
    lf2 = 1.0 / np.sqrt(HID)
    wf2 = jax.random.uniform(ks[4], (1, HID), jnp.float32, -lf2, lf2)
    bf2 = jax.random.uniform(ks[5], (1,), jnp.float32, -lf2, lf2)
    return (w1, b1, w2, b2, wf1, bf1, wf2, bf2)


# ---------------- pure-JAX reference for a sanity check ----------------------------------

def reference_forward(x, params):
    w1, b1, w2, b2, wf1, bf1, wf2, bf2 = params

    def conv1d(v, w, b):
        y = jax.lax.conv_general_dilated(v, w, (1,), "VALID",
                                         dimension_numbers=("NCH", "OIH", "NCH"))
        return y + b[None, :, None]

    def adaptive_max_pool(v, lout):
        lin = v.shape[-1]
        cols = []
        for i in range(lout):
            s = (i * lin) // lout
            e = -((-(i + 1) * lin) // lout)
            cols.append(jnp.max(v[:, :, s:e], axis=-1))
        return jnp.stack(cols, axis=-1)

    h = adaptive_max_pool(jnp.maximum(conv1d(x, w1, b1), 0.0), P1)
    h = adaptive_max_pool(jnp.maximum(conv1d(h, w2, b2), 0.0), P2)
    flat = h.reshape(x.shape[0], -1)
    h = jnp.maximum(flat @ wf1.T + bf1, 0.0)
    return h @ wf2.T + bf2


if __name__ == "__main__":
    key = jax.random.PRNGKey(0)
    pkey, xkey = jax.random.split(key)
    params = init_params(pkey)
    x = jax.random.normal(xkey, (2, 1, L_IN), jnp.float32)

    out = active_cnn_forward(x, params)
    out = jax.block_until_ready(out)

    ref = reference_forward(x, params)
    err = float(jnp.max(jnp.abs(out - ref)))
    scale = float(jnp.max(jnp.abs(ref))) + 1.0
    assert out.shape == (2, 1), out.shape
    assert err <= 1e-2 * scale, f"mismatch: max err {err} vs scale {scale}"
    print("KERNEL_OK")
</pallas_src>

<mosaic_0001>
module attributes {stable_mosaic.version = 11 : i64} {
  func.func @_feature_kernel(%arg0: i32, %arg1: memref<2x1x130xf32, #tpu.memory_space<vmem>>, %arg2: memref<32x3xf32, #tpu.memory_space<vmem>>, %arg3: memref<32x1xf32, #tpu.memory_space<vmem>>, %arg4: memref<128x64xf32, #tpu.memory_space<vmem>>, %arg5: memref<128x64xf32, #tpu.memory_space<vmem>>, %arg6: memref<64x96xf32, #tpu.memory_space<vmem>>, %arg7: memref<64x1xf32, #tpu.memory_space<vmem>>, %arg8: memref<62x64xf32, #tpu.memory_space<vmem>>, %arg9: memref<62x64xf32, #tpu.memory_space<vmem>>, %arg10: memref<128x64xf32, #tpu.memory_space<vmem>>) attributes {dimension_semantics = [#tpu.dimension_semantics<parallel>], iteration_bounds = array<i64: 1>, scalar_prefetch = 0 : i64, scratch_operands = 0 : i64, tpu.core_type = #tpu.core_type<tc>, window_params = [{transform_indices = @transform_0, window_bounds = array<i64: 2, 1, 130>}, {pipeline_mode = #tpu.pipeline_mode<synchronous>, transform_indices = @transform_1, window_bounds = array<i64: 32, 3>}, {pipeline_mode = #tpu.pipeline_mode<synchronous>, transform_indices = @transform_2, window_bounds = array<i64: 32, 1>}, {pipeline_mode = #tpu.pipeline_mode<synchronous>, transform_indices = @transform_3, window_bounds = array<i64: 128, 64>}, {pipeline_mode = #tpu.pipeline_mode<synchronous>, transform_indices = @transform_4, window_bounds = array<i64: 128, 64>}, {pipeline_mode = #tpu.pipeline_mode<synchronous>, transform_indices = @transform_5, window_bounds = array<i64: 64, 96>}, {pipeline_mode = #tpu.pipeline_mode<synchronous>, transform_indices = @transform_6, window_bounds = array<i64: 64, 1>}, {pipeline_mode = #tpu.pipeline_mode<synchronous>, transform_indices = @transform_7, window_bounds = array<i64: 62, 64>}, {pipeline_mode = #tpu.pipeline_mode<synchronous>, transform_indices = @transform_8, window_bounds = array<i64: 62, 64>}, {transform_indices = @transform_9, window_bounds = array<i64: 128, 64>}]} {
    %c0 = arith.constant 0 : index
    %c0_0 = arith.constant 0 : index
    %c0_1 = arith.constant 0 : index
    %0 = vector.load %arg1[%c0, %c0_0, %c0_1] : memref<2x1x130xf32, #tpu.memory_space<vmem>>, vector<2x1x130xf32>
    %1 = vector.shape_cast %0 : vector<2x1x130xf32> to vector<2x130xf32>
    %c0_2 = arith.constant 0 : index
    %c0_3 = arith.constant 0 : index
    %2 = vector.load %arg2[%c0_2, %c0_3] : memref<32x3xf32, #tpu.memory_space<vmem>>, vector<32x3xf32>
    %3 = vector.extract_strided_slice %2 {offsets = [0, 0], sizes = [32, 1], strides = [1, 1]} : vector<32x3xf32> to vector<32x1xf32>
    %4 = vector.shape_cast %3 : vector<32x1xf32> to vector<1x32x1xf32>
    %5 = vector.extract_strided_slice %1 {offsets = [0, 0], sizes = [2, 128], strides = [1, 1]} : vector<2x130xf32> to vector<2x128xf32>
    %6 = vector.shape_cast %5 : vector<2x128xf32> to vector<2x1x128xf32>
    %7 = vector.broadcast %4 : vector<1x32x1xf32> to vector<2x32x128xf32>
    %8 = vector.broadcast %6 : vector<2x1x128xf32> to vector<2x32x128xf32>
    %9 = arith.mulf %7, %8 : vector<2x32x128xf32>
    %10 = vector.extract_strided_slice %2 {offsets = [0, 1], sizes = [32, 1], strides = [1, 1]} : vector<32x3xf32> to vector<32x1xf32>
    %11 = vector.shape_cast %10 : vector<32x1xf32> to vector<1x32x1xf32>
    %12 = vector.extract_strided_slice %1 {offsets = [0, 1], sizes = [2, 128], strides = [1, 1]} : vector<2x130xf32> to vector<2x128xf32>
    %13 = vector.shape_cast %12 : vector<2x128xf32> to vector<2x1x128xf32>
    %14 = vector.broadcast %11 : vector<1x32x1xf32> to vector<2x32x128xf32>
    %15 = vector.broadcast %13 : vector<2x1x128xf32> to vector<2x32x128xf32>
    %16 = arith.mulf %14, %15 : vector<2x32x128xf32>
    %17 = arith.addf %9, %16 : vector<2x32x128xf32>
    %18 = vector.extract_strided_slice %2 {offsets = [0, 2], sizes = [32, 1], strides = [1, 1]} : vector<32x3xf32> to vector<32x1xf32>
    %19 = vector.shape_cast %18 : vector<32x1xf32> to vector<1x32x1xf32>
    %20 = vector.extract_strided_slice %1 {offsets = [0, 2], sizes = [2, 128], strides = [1, 1]} : vector<2x130xf32> to vector<2x128xf32>
    %21 = vector.shape_cast %20 : vector<2x128xf32> to vector<2x1x128xf32>
    %22 = vector.broadcast %19 : vector<1x32x1xf32> to vector<2x32x128xf32>
    %23 = vector.broadcast %21 : vector<2x1x128xf32> to vector<2x32x128xf32>
    %24 = arith.mulf %22, %23 : vector<2x32x128xf32>
    %25 = arith.addf %17, %24 : vector<2x32x128xf32>
    %c0_4 = arith.constant 0 : index
    %c0_5 = arith.constant 0 : index
    %26 = vector.load %arg3[%c0_4, %c0_5] : memref<32x1xf32, #tpu.memory_space<vmem>>, vector<32x1xf32>
    %27 = vector.shape_cast %26 : vector<32x1xf32> to vector<1x32x1xf32>
    %28 = vector.broadcast %27 : vector<1x32x1xf32> to vector<2x32x128xf32>
    %29 = arith.addf %25, %28 : vector<2x32x128xf32>
    %cst = arith.constant 0.000000e+00 : f32
    %30 = vector.broadcast %cst : f32 to vector<2x32x128xf32>
    %31 = arith.maximumf %29, %30 : vector<2x32x128xf32>
    %32 = vector.shape_cast %31 : vector<2x32x128xf32> to vector<64x128xf32>
    %c0_6 = arith.constant 0 : index
    %c0_7 = arith.constant 0 : index
    %33 = vector.load %arg4[%c0_6, %c0_7] : memref<128x64xf32, #tpu.memory_space<vmem>>, vector<128x64xf32>
    %cst_8 = arith.constant dense<0.000000e+00> : vector<64x64xf32>
    %34 = tpu.matmul %32, %33, %cst_8 {dimension_numbers = #tpu.dot_dimension_numbers<[1], [0], [0], [1], [0, 0, 1, 1], [], []>} : vector<64x128xf32>, vector<128x64xf32>, vector<64x64xf32> -> vector<64x64xf32>
    %c0_9 = arith.constant 0 : index
    %c0_10 = arith.constant 0 : index
    %35 = vector.load %arg5[%c0_9, %c0_10] : memref<128x64xf32, #tpu.memory_space<vmem>>, vector<128x64xf32>
    %cst_11 = arith.constant dense<0.000000e+00> : vector<64x64xf32>
    %36 = tpu.matmul %32, %35, %cst_11 {dimension_numbers = #tpu.dot_dimension_numbers<[1], [0], [0], [1], [0, 0, 1, 1], [], []>} : vector<64x128xf32>, vector<128x64xf32>, vector<64x64xf32> -> vector<64x64xf32>
    %37 = arith.maximumf %34, %36 : vector<64x64xf32>
    %38 = vector.shape_cast %37 : vector<64x64xf32> to vector<2x32x64xf32>
    %c0_12 = arith.constant 0 : index
    %c0_13 = arith.constant 0 : index
    %39 = vector.load %arg6[%c0_12, %c0_13] : memref<64x96xf32, #tpu.memory_space<vmem>>, vector<64x96xf32>
    %c0_14 = arith.constant 0 : index
    %c0_15 = arith.constant 0 : index
    %40 = vector.load %arg7[%c0_14, %c0_15] : memref<64x1xf32, #tpu.memory_space<vmem>>, vector<64x1xf32>
    %41 = vector.extract_strided_slice %38 {offsets = [0, 0, 0], sizes = [1, 32, 62], strides = [1, 1, 1]} : vector<2x32x64xf32> to vector<1x32x62xf32>
    %42 = vector.shape_cast %41 : vector<1x32x62xf32> to vector<32x62xf32>
    %43 = vector.extract_strided_slice %38 {offsets = [0, 0, 1], sizes = [1, 32, 62], strides = [1, 1, 1]} : vector<2x32x64xf32> to vector<1x32x62xf32>
    %44 = vector.shape_cast %43 : vector<1x32x62xf32> to vector<32x62xf32>
    %45 = vector.extract_strided_slice %38 {offsets = [0, 0, 2], sizes = [1, 32, 62], strides = [1, 1, 1]} : vector<2x32x64xf32> to vector<1x32x62xf32>
    %46 = vector.shape_cast %45 : vector<1x32x62xf32> to vector<32x62xf32>
    %47 = tpu.concatenate %42, %44, %46 in 0 : vector<32x62xf32>, vector<32x62xf32>, vector<32x62xf32> -> vector<96x62xf32>
    %cst_16 = arith.constant dense<0.000000e+00> : vector<64x62xf32>
    %48 = tpu.matmul %39, %47, %cst_16 {dimension_numbers = #tpu.dot_dimension_numbers<[1], [0], [0], [1], [0, 0, 1, 1], [], []>} : vector<64x96xf32>, vector<96x62xf32>, vector<64x62xf32> -> vector<64x62xf32>
    %49 = vector.broadcast %40 : vector<64x1xf32> to vector<64x62xf32>
    %50 = arith.addf %48, %49 : vector<64x62xf32>
    %cst_17 = arith.constant 0.000000e+00 : f32
    %51 = vector.broadcast %cst_17 : f32 to vector<64x62xf32>
    %52 = arith.maximumf %50, %51 : vector<64x62xf32>
    %53 = vector.extract_strided_slice %38 {offsets = [1, 0, 0], sizes = [1, 32, 62], strides = [1, 1, 1]} : vector<2x32x64xf32> to vector<1x32x62xf32>
    %54 = vector.shape_cast %53 : vector<1x32x62xf32> to vector<32x62xf32>
    %55 = vector.extract_strided_slice %38 {offsets = [1, 0, 1], sizes = [1, 32, 62], strides = [1, 1, 1]} : vector<2x32x64xf32> to vector<1x32x62xf32>
    %56 = vector.shape_cast %55 : vector<1x32x62xf32> to vector<32x62xf32>
    %57 = vector.extract_strided_slice %38 {offsets = [1, 0, 2], sizes = [1, 32, 62], strides = [1, 1, 1]} : vector<2x32x64xf32> to vector<1x32x62xf32>
    %58 = vector.shape_cast %57 : vector<1x32x62xf32> to vector<32x62xf32>
    %59 = tpu.concatenate %54, %56, %58 in 0 : vector<32x62xf32>, vector<32x62xf32>, vector<32x62xf32> -> vector<96x62xf32>
    %cst_18 = arith.constant dense<0.000000e+00> : vector<64x62xf32>
    %60 = tpu.matmul %39, %59, %cst_18 {dimension_numbers = #tpu.dot_dimension_numbers<[1], [0], [0], [1], [0, 0, 1, 1], [], []>} : vector<64x96xf32>, vector<96x62xf32>, vector<64x62xf32> -> vector<64x62xf32>
    %61 = vector.broadcast %40 : vector<64x1xf32> to vector<64x62xf32>
    %62 = arith.addf %60, %61 : vector<64x62xf32>
    %cst_19 = arith.constant 0.000000e+00 : f32
    %63 = vector.broadcast %cst_19 : f32 to vector<64x62xf32>
    %64 = arith.maximumf %62, %63 : vector<64x62xf32>
    %65 = tpu.concatenate %52, %64 in 0 : vector<64x62xf32>, vector<64x62xf32> -> vector<128x62xf32>
    %c0_20 = arith.constant 0 : index
    %c0_21 = arith.constant 0 : index
    %66 = vector.load %arg8[%c0_20, %c0_21] : memref<62x64xf32, #tpu.memory_space<vmem>>, vector<62x64xf32>
    %cst_22 = arith.constant dense<0.000000e+00> : vector<128x64xf32>
    %67 = tpu.matmul %65, %66, %cst_22 {dimension_numbers = #tpu.dot_dimension_numbers<[1], [0], [0], [1], [0, 0, 1, 1], [], []>} : vector<128x62xf32>, vector<62x64xf32>, vector<128x64xf32> -> vector<128x64xf32>
    %c0_23 = arith.constant 0 : index
    %c0_24 = arith.constant 0 : index
    %68 = vector.load %arg9[%c0_23, %c0_24] : memref<62x64xf32, #tpu.memory_space<vmem>>, vector<62x64xf32>
    %cst_25 = arith.constant dense<0.000000e+00> : vector<128x64xf32>
    %69 = tpu.matmul %65, %68, %cst_25 {dimension_numbers = #tpu.dot_dimension_numbers<[1], [0], [0], [1], [0, 0, 1, 1], [], []>} : vector<128x62xf32>, vector<62x64xf32>, vector<128x64xf32> -> vector<128x64xf32>
    %70 = arith.maximumf %67, %69 : vector<128x64xf32>
    %c0_26 = arith.constant 0 : index
    %c0_27 = arith.constant 0 : index
    %71 = vector.load %arg10[%c0_26, %c0_27] : memref<128x64xf32, #tpu.memory_space<vmem>>, vector<128x64xf32>
    tpu.vector_store %arg10[%c0_26, %c0_27], %70 {strides = array<i32>} : memref<128x64xf32, #tpu.memory_space<vmem>>, vector<128x64xf32>,
    return
  }
  func.func @transform_0(%arg0: i32) -> (i32, i32, i32) {
    %c0_i32 = arith.constant 0 : i32
    %c0_i32_0 = arith.constant 0 : i32
    %c0_i32_1 = arith.constant 0 : i32
    return %arg0, %c0_i32, %c0_i32_0 : i32, i32, i32
  }
  func.func @transform_1(%arg0: i32) -> (i32, i32) {
    %c0_i32 = arith.constant 0 : i32
    %c0_i32_0 = arith.constant 0 : i32
    %c0_i32_1 = arith.constant 0 : i32
    return %c0_i32, %c0_i32_0 : i32, i32
  }
  func.func @transform_2(%arg0: i32) -> (i32, i32) {
    %c0_i32 = arith.constant 0 : i32
    %c0_i32_0 = arith.constant 0 : i32
    %c0_i32_1 = arith.constant 0 : i32
    return %c0_i32, %c0_i32_0 : i32, i32
  }
  func.func @transform_3(%arg0: i32) -> (i32, i32) {
    %c0_i32 = arith.constant 0 : i32
    %c0_i32_0 = arith.constant 0 : i32
    %c0_i32_1 = arith.constant 0 : i32
    return %c0_i32, %c0_i32_0 : i32, i32
  }
  func.func @transform_4(%arg0: i32) -> (i32, i32) {
    %c0_i32 = arith.constant 0 : i32
    %c0_i32_0 = arith.constant 0 : i32
    %c0_i32_1 = arith.constant 0 : i32
    return %c0_i32, %c0_i32_0 : i32, i32
  }
  func.func @transform_5(%arg0: i32) -> (i32, i32) {
    %c0_i32 = arith.constant 0 : i32
    %c0_i32_0 = arith.constant 0 : i32
    %c0_i32_1 = arith.constant 0 : i32
    return %c0_i32, %c0_i32_0 : i32, i32
  }
  func.func @transform_6(%arg0: i32) -> (i32, i32) {
    %c0_i32 = arith.constant 0 : i32
    %c0_i32_0 = arith.constant 0 : i32
    %c0_i32_1 = arith.constant 0 : i32
    return %c0_i32, %c0_i32_0 : i32, i32
  }
  func.func @transform_7(%arg0: i32) -> (i32, i32) {
    %c0_i32 = arith.constant 0 : i32
    %c0_i32_0 = arith.constant 0 : i32
    %c0_i32_1 = arith.constant 0 : i32
    return %c0_i32, %c0_i32_0 : i32, i32
  }
  func.func @transform_8(%arg0: i32) -> (i32, i32) {
    %c0_i32 = arith.constant 0 : i32
    %c0_i32_0 = arith.constant 0 : i32
    %c0_i32_1 = arith.constant 0 : i32
    return %c0_i32, %c0_i32_0 : i32, i32
  }
  func.func @transform_9(%arg0: i32) -> (i32, i32) {
    %c0_i32 = arith.constant 0 : i32
    %c0_i32_0 = arith.constant 0 : i32
    return %arg0, %c0_i32 : i32, i32
  }
}

</mosaic_0001>

<bundles_post_ra>
// kernel: tpu_custom_call.1
= control target key start
LH: loop header
LB: loop body
LE: loop exit
PB: predicated region body
PF: predicated region fallthrough
CT: control target
= control target key end

     0   :  { %v1788_v0 = vmov 1   ;;  %v1789_v2 = vmov 2   ;;  %v1790_v6 = vmov 0   ;;  %v60_v25 = vlaneseq  ;;  %s1792_s19 = smov 126   ;;  %s2415_s1 = inlined_call_operand.vmem [shape: f32[32,3], index: 1, kind: input, shape index: {}]   ;;  %s2416_s2 = inlined_call_operand.vmem [shape: f32[32,1], index: 2, kind: input, shape index: {}]   ;;  %s2417_s3 = inlined_call_operand.vmem [shape: f32[128,64], index: 3, kind: input, shape index: {}]   ;;  %s2418_s4 = inlined_call_operand.vmem [shape: f32[128,64], index: 4, kind: input, shape index: {}]   ;;  %s2419_s0 = inlined_call_operand.vmem [shape: f32[2,1,130], index: 0, kind: input, shape index: {}]   ;;  %s2420_s5 = inlined_call_operand.vmem [shape: f32[64,96], index: 5, kind: input, shape index: {}]   ;;  %s2421_s6 = inlined_call_operand.vmem [shape: f32[64,1], index: 6, kind: input, shape index: {}]   ;;  %s2422_s7 = inlined_call_operand.vmem [shape: f32[62,64], index: 7, kind: input, shape index: {}]   ;;  %s2423_s8 = inlined_call_operand.vmem [shape: f32[62,64], index: 8, kind: input, shape index: {}]   ;;  %s2424_s9 = inlined_call_operand.vmem [shape: f32[128,64], index: 9, kind: output, shape index: {}]  }
   0x1   :  { %1781 = vset.pattern.permute.xlu0 %v1788_v0  ;;  %v34_v1 = vld [vmem:[%s2415_s1] sm:$0xff]  ;;  %1782 = vset.pattern.permute.xlu1 %v1789_v2  ;;  %v35_v3 = vld [vmem:[%s2415_s1 + $0x8] sm:$0xff]  ;;  %v36_v4 = vld [vmem:[%s2415_s1 + $0x10] sm:$0xff]  ;;  %vm168_vm0 = vcmask 1039360   ;;  %vm273_vm1 = vcmask 1031168   ;;  %vm672_vm2 = vcmask 785408  }
   0x2   :  { %79 = vperm.xlu0 %1781, %v34_v1   ;;  %194 = vperm.xlu1 %1782, %v34_v1   ;;  %v37_v5 = vld [vmem:[%s2415_s1 + $0x18] sm:$0xff]  ;;  %v298_v7 = vld [vmem:[%s2416_s2] sm:$0xff]  ;;  %v300_v8 = vld [vmem:[%s2416_s2 + $0x10] sm:$0xff]  ;;  %v1909_v26 = vshrl.u32 %v60_v25, 7  ;;  %vm1008_vm3 = vcmask 1045504   ;;  %vm959_vm4 = vcmask 506880  }
   0x3   :  { %v299_v9 = vld [vmem:[%s2416_s2 + $0x8] sm:$0xff]  ;;  %v301_v10 = vld [vmem:[%s2416_s2 + $0x18] sm:$0xff]  ;;  %v352_v13 = vld [vmem:[%s2417_s3 + $0x70] sm:$0xff]  ;;  %s1791_s2 = smov 127   ;;  %vm1329_vm5 = vcmask 523264  }
   0x4   :  { %v353_v11 = vld [vmem:[%s2417_s3 + $0x78] sm:$0xff]  ;;  %v473_v14 = vld [vmem:[%s2418_s4 + $0x70] sm:$0xff]  ;;  %v351_v15 = vld [vmem:[%s2417_s3 + $0x68] sm:$0xff]  ;;  %v62_v31 = vsub.s32 0, %v1909_v26  ;;  %v96_v32 = vsub.s32 1, %v1909_v26 }
   0x5   :  { %v474_v12 = vld [vmem:[%s2418_s4 + $0x78] sm:$0xff]  ;;  %1536 = vmatprep.subr.mxu0 %v353_v11  ;;  %v472_v16 = vld [vmem:[%s2418_s4 + $0x68] sm:$0xff]  ;;  %v350_v17 = vld [vmem:[%s2417_s3 + $0x60] sm:$0xff] }
   0x6   :  { %83 = vperm.xlu0 %1781, %v35_v3   ;;  %198 = vperm.xlu1 %1782, %v35_v3   ;;  %v471_v18 = vld [vmem:[%s2418_s4 + $0x60] sm:$0xff]  ;;  %v349_v19 = vld [vmem:[%s2417_s3 + $0x58] sm:$0xff]  ;;  %v348_v21 = vld [vmem:[%s2417_s3 + $0x50] sm:$0xff] }
   0x7   :  { %1580 = vmatprep.subr.mxu1 %v474_v12  ;;  %1537 = vmatpush3.msra.mxu0 %v353_v11  ;;  %v470_v20 = vld [vmem:[%s2418_s4 + $0x58] sm:$0xff]  ;;  %v469_v22 = vld [vmem:[%s2418_s4 + $0x50] sm:$0xff]  ;;  %v347_v23 = vld [vmem:[%s2417_s3 + $0x48] sm:$0xff] }
   0x8   :  { %1581 = vmatpush3.msra.mxu1 %v474_v12  ;;  %1538 = vmatprep.subr.mxu0 %v352_v13  ;;  %v468_v24 = vld [vmem:[%s2418_s4 + $0x48] sm:$0xff]  ;;  %v346_v27 = vld [vmem:[%s2417_s3 + $0x40] sm:$0xff]  ;;  %v345_v29 = vld [vmem:[%s2417_s3 + $0x38] sm:$0xff] }
   0x9   :  { %1582 = vmatprep.subr.mxu1 %v473_v14  ;;  %1539 = vmatpush3.msra.mxu0 %v352_v13  ;;  %v467_v28 = vld [vmem:[%s2418_s4 + $0x40] sm:$0xff]  ;;  %v466_v30 = vld [vmem:[%s2418_s4 + $0x38] sm:$0xff]  ;;  %v344_v34 = vld [vmem:[%s2417_s3 + $0x30] sm:$0xff] }
   0xa   :  { %87 = vperm.xlu0 %1781, %v36_v4   ;;  %1783 = vset.pattern.permute.xlu1 %v1788_v0  ;;  %v32_v33 = vld [vmem:[%s2419_s0] sm:$0x3]  ;;  %v465_v35 = vld [vmem:[%s2418_s4 + $0x30] sm:$0xff]  ;;  %v343_v36 = vld [vmem:[%s2417_s3 + $0x28] sm:$0xff] }
   0xb   :  { %91 = vperm.xlu1 %1783, %v37_v5   ;;  %1583 = vmatpush3.msra.mxu1 %v473_v14  ;;  %v464_v37 = vld [vmem:[%s2418_s4 + $0x28] sm:$0xff]  ;;  %v1942_v38 = vrot.slane %v32_v33, %v96_v32  ;;  %v1946_v39 = vrot.slane %v32_v33, %v62_v31  ;;  %v342_v40 = vld [vmem:[%s2417_s3 + $0x20] sm:$0xff]  ;;  %v341_v46 = vld [vmem:[%s2417_s3 + $0x18] sm:$0xff] }
   0xc   :  { %1540 = vmatprep.subr.mxu0 %v351_v15  ;;  %1584 = vmatprep.subr.mxu1 %v472_v16  ;;  %v463_v41 = vld [vmem:[%s2418_s4 + $0x20] sm:$0xff]  ;;  %v462_v47 = vld [vmem:[%s2418_s4 + $0x18] sm:$0xff]  ;;  %v340_v51 = vld [vmem:[%s2417_s3 + $0x10] sm:$0xff] }
   0xd   :  { %1541 = vmatpush3.msra.mxu0 %v351_v15  ;;  %1585 = vmatpush3.msra.mxu1 %v472_v16  ;;  %v461_v52 = vld [vmem:[%s2418_s4 + $0x10] sm:$0xff]  ;;  %v339_v56 = vld [vmem:[%s2417_s3 + $0x8] sm:$0xff]  ;;  %v338_v59 = vld [vmem:[%s2417_s3] sm:$0xff] }
   0xe   :  { %1784 = vset.pattern.permute.xlu0 %v1789_v2  ;;  %1542 = vmatprep.subr.mxu0 %v350_v17  ;;  %v460_v57 = vld [vmem:[%s2418_s4 + $0x8] sm:$0xff]  ;;  %v459_v62 = vld [vmem:[%s2418_s4] sm:$0xff] }
   0xf   :  { %202 = vperm.xlu0 %1784, %v36_v4   ;;  %1785 = vset.pattern.permute.xlu1 %v1789_v2 }
  0x10   :  { %206 = vperm.xlu1 %1785, %v37_v5   ;;  %1586 = vmatprep.subr.mxu1 %v471_v18 }
  0x11   :  { %1543 = vmatpush3.msra.mxu0 %v350_v17  ;;  %1587 = vmatpush3.msra.mxu1 %v471_v18 }
  0x12   :  { %1544 = vmatprep.subr.mxu0 %v349_v19  ;;  %1588 = vmatprep.subr.mxu1 %v470_v20 }
  0x13   :  { %1787 = vset.pattern.permute.xlu0 %v1790_v6  ;;  %1545 = vmatpush3.msra.mxu0 %v349_v19 }
  0x14   :  { %1786 = vset.pattern.permute.xlu1 %v1790_v6  ;;  %45 = vperm.xlu0 %1787, %v35_v3  }
  0x15   :  { %40 = vperm.xlu1 %1786, %v34_v1   ;;  %1589 = vmatpush3.msra.mxu1 %v470_v20 }
  0x16   :  { %1546 = vmatprep.subr.mxu0 %v348_v21  ;;  %1590 = vmatprep.subr.mxu1 %v469_v22 }
  0x17   :  { %1547 = vmatpush3.msra.mxu0 %v348_v21  ;;  %1591 = vmatpush3.msra.mxu1 %v469_v22 }
  0x18   :  { %304 = vperm.xlu0 %1787, %v298_v7   ;;  %1548 = vmatprep.subr.mxu0 %v347_v23 }
  0x19   :  { %50 = vperm.xlu1 %1786, %v36_v4   ;;  %1592 = vmatprep.subr.mxu1 %v468_v24 }
  0x1a   :  { %1549 = vmatpush3.msra.mxu0 %v347_v23  ;;  %1593 = vmatpush3.msra.mxu1 %v468_v24 }
  0x1b   :  { %1550 = vmatprep.subr.mxu0 %v346_v27  ;;  %1594 = vmatprep.subr.mxu1 %v467_v28 }
  0x1c   :  { %314 = vperm.xlu0 %1787, %v300_v8   ;;  %1551 = vmatpush3.msra.mxu0 %v346_v27 }
  0x1d   :  { %55 = vperm.xlu1 %1786, %v37_v5   ;;  %1595 = vmatpush3.msra.mxu1 %v467_v28  ;;  %v33_v5 = vld [vmem:[%s2419_s0 + $0x2] sm:$0x3] }
  0x1e   :  { %1552 = vmatprep.subr.mxu0 %v345_v29  ;;  %1596 = vmatprep.subr.mxu1 %v466_v30  ;;  %v2027_v8 = vrot.slane %v33_v5, %v62_v31  ;;  %v101_v17 = vrot.slane %v33_v5, %v96_v32 }
  0x1f   :  { %1553 = vmatpush3.msra.mxu0 %v345_v29  ;;  %1597 = vmatpush3.msra.mxu1 %v466_v30 }
  0x20   :  { %1554 = vmatprep.subr.mxu0 %v344_v34  ;;  %1598 = vmatprep.subr.mxu1 %v465_v35 }
  0x21   :  { %309 = vperm.xlu1 %1786, %v299_v9   ;;  %1555 = vmatpush3.msra.mxu0 %v344_v34 }
  0x22   :  { %1599 = vmatpush3.msra.mxu1 %v465_v35  ;;  %1556 = vmatprep.subr.mxu0 %v343_v36 }
  0x23   :  { %1600 = vmatprep.subr.mxu1 %v464_v37  ;;  %1557 = vmatpush3.msra.mxu0 %v343_v36 }
  0x24   :  { %1601 = vmatpush3.msra.mxu1 %v464_v37  ;;  %1558 = vmatprep.subr.mxu0 %v342_v40 }
  0x25   :  { %319 = vperm.xlu1 %1786, %v301_v10   ;;  %1602 = vmatprep.subr.mxu1 %v463_v41 }
  0x26   :  { %1559 = vmatpush3.msra.mxu0 %v342_v40  ;;  %1603 = vmatpush3.msra.mxu1 %v463_v41 }
  0x27   :  { %1560 = vmatprep.subr.mxu0 %v341_v46  ;;  %1604 = vmatprep.subr.mxu1 %v462_v47 }
  0x28   :  { %1561 = vmatpush3.msra.mxu0 %v341_v46  ;;  %1605 = vmatpush3.msra.mxu1 %v462_v47 }
  0x29   :  { %1562 = vmatprep.subr.mxu0 %v340_v51  ;;  %1606 = vmatprep.subr.mxu1 %v461_v52 }
  0x2a   :  { %1563 = vmatpush3.msra.mxu0 %v340_v51  ;;  %1607 = vmatpush3.msra.mxu1 %v461_v52 }
  0x2b   :  { %1564 = vmatprep.subr.mxu0 %v339_v56  ;;  %1608 = vmatprep.subr.mxu1 %v460_v57 }
  0x2c   :  { %1565 = vmatpush3.msra.mxu0 %v339_v56  ;;  %1609 = vmatpush3.msra.mxu1 %v460_v57 }
  0x2d   :  { %1566 = vmatprep.subr.mxu0 %v338_v59  ;;  %1610 = vmatprep.subr.mxu1 %v459_v62 }
  0x2e   :  { %1567 = vmatpush3.msra.mxu0 %v338_v59  ;;  %1611 = vmatpush3.msra.mxu1 %v459_v62 }
  0x7d   :  { %v1954_v42 = vpop.permute.xlu0 %79  ;;  %v1960_v45 = vpop.permute.xlu1 %194 }
  0x7e   :  { %v105_v43 = vmul.f32 %v1942_v38, %v1954_v42  ;;  %v104_v44 = vmul.f32 %v1954_v42, %v1946_v39  ;;  %v210_v54 = vmul.f32 %v1960_v45, %v1942_v38  ;;  %v209_v55 = vmul.f32 %v1960_v45, %v1946_v39 }
  0x7f   :  { %v113_v18 = vmul.f32 %v101_v17, %v1954_v42  ;;  %v112_v19 = vmul.f32 %v1954_v42, %v2027_v8  ;;  %v218_v22 = vmul.f32 %v1960_v45, %v101_v17  ;;  %v217_v23 = vmul.f32 %v1960_v45, %v2027_v8 }
  0x80   :  { %138 = vrot.lane.b32.xlu1 %v105_v43, %s1791_s2  ;;  %136 = vrot.lane.b32.xlu0 %v104_v44, %s1791_s2 }
  0x81   :  { %v1970_v48 = vpop.permute.xlu0 %83  ;;  %v1984_v53 = vpop.permute.xlu1 %198 }
  0x82   :  { %v106_v49 = vmul.f32 %v1970_v48, %v1946_v39  ;;  %v107_v50 = vmul.f32 %v1942_v38, %v1970_v48  ;;  %v212_v60 = vmul.f32 %v1984_v53, %v1942_v38  ;;  %v211_v61 = vmul.f32 %v1984_v53, %v1946_v39 }
  0x83   :  { %v115_v20 = vmul.f32 %v101_v17, %v1970_v48  ;;  %v114_v21 = vmul.f32 %v1970_v48, %v2027_v8  ;;  %v220_v24 = vmul.f32 %v1984_v53, %v101_v17  ;;  %v219_v25 = vmul.f32 %v1984_v53, %v2027_v8 }
  0x84   :  { %140 = vrot.lane.b32.xlu1 %v106_v49, %s1791_s2  ;;  %142 = vrot.lane.b32.xlu0 %v107_v50, %s1791_s2 }
  0x85   :  { %v88_v63 = vpop.permute.xlu0 %87 }
  0x86   :  { %v1998_v58 = vpop.permute.xlu1 %91  ;;  %v109_v1 = vmul.f32 %v1942_v38, %v88_v63  ;;  %v108_v2 = vmul.f32 %v88_v63, %v1946_v39  ;;  %v117_v26 = vmul.f32 %v101_v17, %v88_v63  ;;  %v116_v27 = vmul.f32 %v88_v63, %v2027_v8 }
  0x87   :  { %v110_v3 = vmul.f32 %v1998_v58, %v1946_v39  ;;  %v111_v4 = vmul.f32 %v1942_v38, %v1998_v58  ;;  %v119_v28 = vmul.f32 %v101_v17, %v1998_v58  ;;  %v118_v29 = vmul.f32 %v1998_v58, %v2027_v8 }
  0x88   :  { %243 = vrot.lane.b32.xlu1 %v210_v54, %s1792_s19  ;;  %241 = vrot.lane.b32.xlu0 %v209_v55, %s1792_s19 }
  0x8a   :  { %v203_v7 = vpop.permute.xlu0 %202 }
  0x8b   :  { %v207_v0 = vpop.permute.xlu1 %206  ;;  %v214_v9 = vmul.f32 %v203_v7, %v1942_v38  ;;  %v213_v10 = vmul.f32 %v203_v7, %v1946_v39  ;;  %v222_v30 = vmul.f32 %v203_v7, %v101_v17  ;;  %v221_v31 = vmul.f32 %v203_v7, %v2027_v8 }
  0x8c   :  { %247 = vrot.lane.b32.xlu1 %v212_v60, %s1792_s19  ;;  %245 = vrot.lane.b32.xlu0 %v211_v61, %s1792_s19  ;;  %v216_v13 = vmul.f32 %v207_v0, %v1942_v38  ;;  %v215_v14 = vmul.f32 %v207_v0, %v1946_v39  ;;  %v224_v32 = vmul.f32 %v207_v0, %v101_v17 }
  0x8d   :  { %v223_v33 = vmul.f32 %v207_v0, %v2027_v8 }
  0x8f   :  { %v2087_v34 = vpop.permute.xlu0 %45 }
  0x90   :  { %146 = vrot.lane.b32.xlu1 %v109_v1, %s1791_s2  ;;  %144 = vrot.lane.b32.xlu0 %v108_v2, %s1791_s2  ;;  %v2023_v6 = vpop.permute.xlu1 %40  ;;  %v71_v51 = vmul.f32 %v1946_v39, %v2087_v34 }
  0x91   :  { %v70_v45 = vmul.f32 %v1946_v39, %v2023_v6 }
  0x93   :  { %v2091_v36 = vpop.permute.xlu0 %304 }
  0x94   :  { %148 = vrot.lane.b32.xlu1 %v110_v3, %s1791_s2  ;;  %150 = vrot.lane.b32.xlu0 %v111_v4, %s1791_s2  ;;  %v2033_v11 = vpop.permute.xlu1 %50 }
  0x95   :  { %v2037_v12 = vmul.f32 %v2027_v8, %v2033_v11  ;;  %v72_v3 = vmul.f32 %v1946_v39, %v2033_v11 }
  0x97   :  { %v2095_v38 = vpop.permute.xlu0 %314 }
  0x98   :  { %251 = vrot.lane.b32.xlu1 %v214_v9, %s1792_s19  ;;  %249 = vrot.lane.b32.xlu0 %v213_v10, %s1792_s19  ;;  %v2043_v15 = vpop.permute.xlu1 %55 }
  0x99   :  { %v2047_v16 = vmul.f32 %v2027_v8, %v2043_v15 }
  0x9c   :  { %255 = vrot.lane.b32.xlu1 %v216_v13, %s1792_s19  ;;  %253 = vrot.lane.b32.xlu0 %v215_v14, %s1792_s19  ;;  %v2089_v35 = vpop.permute.xlu1 %309  ;;  %v73_v13 = vmul.f32 %v1946_v39, %v2043_v15  ;;  %v74_v15 = vmul.f32 %v2027_v8, %v2023_v6 }
  0xa0   :  { %154 = vrot.lane.b32.xlu1 %v113_v18, %s1791_s2  ;;  %152 = vrot.lane.b32.xlu0 %v112_v19, %s1791_s2  ;;  %v2093_v37 = vpop.permute.xlu1 %319 }
  0xa4   :  { %158 = vrot.lane.b32.xlu1 %v115_v20, %s1791_s2  ;;  %156 = vrot.lane.b32.xlu0 %v114_v21, %s1791_s2 }
  0xa8   :  { %259 = vrot.lane.b32.xlu1 %v218_v22, %s1792_s19  ;;  %257 = vrot.lane.b32.xlu0 %v217_v23, %s1792_s19 }
  0xac   :  { %263 = vrot.lane.b32.xlu1 %v220_v24, %s1792_s19  ;;  %261 = vrot.lane.b32.xlu0 %v219_v25, %s1792_s19 }
  0xb0   :  { %162 = vrot.lane.b32.xlu1 %v117_v26, %s1791_s2  ;;  %160 = vrot.lane.b32.xlu0 %v116_v27, %s1791_s2 }
  0xb4   :  { %166 = vrot.lane.b32.xlu1 %v119_v28, %s1791_s2  ;;  %164 = vrot.lane.b32.xlu0 %v118_v29, %s1791_s2 }
  0xb8   :  { %267 = vrot.lane.b32.xlu1 %v222_v30, %s1792_s19  ;;  %265 = vrot.lane.b32.xlu0 %v221_v31, %s1792_s19 }
  0xbc   :  { %271 = vrot.lane.b32.xlu1 %v224_v32, %s1792_s19  ;;  %269 = vrot.lane.b32.xlu0 %v223_v33, %s1792_s19 }
  0xf2   :  { %v139_v40 = vpop.permute.xlu1 %138  ;;  %v137_v41 = vpop.permute.xlu0 %136 }
  0xf3   :  { %v169_v44 = vsel %vm168_vm0, %v137_v41, %v139_v40  ;;  %v75_v40 = vmul.f32 %v2027_v8, %v2087_v34 }
  0xf4   :  { %v185_v46 = vadd.f32 %v169_v44, %v70_v45 }
  0xf6   :  { %v141_v42 = vpop.permute.xlu1 %140  ;;  %v143_v43 = vpop.permute.xlu0 %142 }
  0xf7   :  { %v170_v49 = vsel %vm168_vm0, %v141_v42, %v143_v43 }
  0xf8   :  { %v186_v53 = vadd.f32 %v170_v49, %v71_v51 }
  0xfa   :  { %v244_v47 = vpop.permute.xlu1 %243  ;;  %v242_v48 = vpop.permute.xlu0 %241 }
  0xfb   :  { %v274_v50 = vsel %vm273_vm1, %v242_v48, %v244_v47 }
  0xfc   :  { %v290_v52 = vadd.f32 %v274_v50, %v185_v46 }
  0xfe   :  { %v248_v54 = vpop.permute.xlu1 %247  ;;  %v246_v55 = vpop.permute.xlu0 %245  ;;  %v322_v56 = vadd.f32 %v2091_v36, %v290_v52 }
  0xff   :  { %v275_v57 = vsel %vm273_vm1, %v246_v55, %v248_v54 }
 0x100   :  { %v291_v58 = vadd.f32 %v275_v57, %v186_v53  ;;  %v330_v59 = vmax.f32 %v322_v56, 0.0 }
 0x102   :  { %v147_v60 = vpop.permute.xlu1 %146  ;;  %v145_v61 = vpop.permute.xlu0 %144  ;;  %1568 = vmatprep.mubr.f32.mxu0 %v330_v59  ;;  %1612 = vmatprep.mubr.f32.mxu1 %v330_v59  ;;  %v323_v62 = vadd.f32 %v2089_v35, %v291_v58 }
 0x103   :  { %v171_v2 = vsel %vm168_vm0, %v145_v61, %v147_v60 }
 0x104   :  { %v331_v63 = vmax.f32 %v323_v62, 0.0  ;;  %v187_v4 = vadd.f32 %v171_v2, %v72_v3 }
 0x106   :  { %v149_v0 = vpop.permute.xlu1 %148  ;;  %v151_v1 = vpop.permute.xlu0 %150  ;;  %1569 = vmatmul.mubr.f32.vlgmr.msra.gmra.mxu0 %v331_v63  ;;  %1613 = vmatmul.mubr.f32.vlgmr.msra.gmra.mxu1 %v331_v63 }
 0x107   :  { %v172_v9 = vsel %vm168_vm0, %v149_v0, %v151_v1 }
 0x108   :  { %v188_v17 = vadd.f32 %v172_v9, %v73_v13 }
 0x10a   :  { %v252_v5 = vpop.permute.xlu1 %251  ;;  %v250_v7 = vpop.permute.xlu0 %249 }
 0x10b   :  { %v276_v10 = vsel %vm273_vm1, %v250_v7, %v252_v5 }
 0x10c   :  { %v292_v14 = vadd.f32 %v276_v10, %v187_v4 }
 0x10e   :  { %v256_v18 = vpop.permute.xlu1 %255  ;;  %v254_v19 = vpop.permute.xlu0 %253  ;;  %v324_v20 = vadd.f32 %v2095_v38, %v292_v14  ;;  %v588_v14 = vld [vmem:[%s2420_s5] sm:$0xff] }
 0x10f   :  { %v277_v21 = vsel %vm273_vm1, %v254_v19, %v256_v18 }
 0x110   :  { %v293_v22 = vadd.f32 %v277_v21, %v188_v17  ;;  %v332_v11 = vmax.f32 %v324_v20, 0.0 }
 0x112   :  { %v155_v23 = vpop.permute.xlu1 %154  ;;  %v153_v24 = vpop.permute.xlu0 %152  ;;  %1571 = vmatprep.mubr.f32.mxu0 %v332_v11  ;;  %1615 = vmatprep.mubr.f32.mxu1 %v332_v11  ;;  %v325_v25 = vadd.f32 %v2093_v37, %v293_v22 }
 0x113   :  { %v173_v39 = vsel %vm168_vm0, %v153_v24, %v155_v23 }
 0x114   :  { %v333_v26 = vmax.f32 %v325_v25, 0.0  ;;  %v189_v29 = vadd.f32 %v173_v39, %v74_v15  ;;  %v597_v39 = vld [vmem:[%s2421_s6 + $0x8] sm:$0xff]  ;;  %v598_v15 = vld [vmem:[%s2421_s6 + $0x10] sm:$0xff] }
 0x116   :  { %v159_v27 = vpop.permute.xlu1 %158  ;;  %v157_v28 = vpop.permute.xlu0 %156  ;;  %1572 = vmatmul.mubr.f32.gmra.mxu0 %v333_v26  ;;  %1616 = vmatmul.mubr.f32.gmra.mxu1 %v333_v26 }
 0x117   :  { %v174_v32 = vsel %vm168_vm0, %v157_v28, %v159_v27  ;;  %v596_v28 = vld [vmem:[%s2421_s6] sm:$0xff] }
 0x118   :  { %v190_v42 = vadd.f32 %v174_v32, %v75_v40  ;;  %v602_v32 = vld [vmem:[%s2421_s6 + $0x30] sm:$0xff] }
 0x11a   :  { %v260_v30 = vpop.permute.xlu1 %259  ;;  %v258_v31 = vpop.permute.xlu0 %257 }
 0x11b   :  { %v278_v33 = vsel %vm273_vm1, %v258_v31, %v260_v30  ;;  %v600_v30 = vld [vmem:[%s2421_s6 + $0x20] sm:$0xff]  ;;  %v601_v31 = vld [vmem:[%s2421_s6 + $0x28] sm:$0xff] }
 0x11c   :  { %v294_v41 = vadd.f32 %v278_v33, %v189_v29  ;;  %v599_v29 = vld [vmem:[%s2421_s6 + $0x18] sm:$0xff] }
 0x11d   :  { %v603_v33 = vld [vmem:[%s2421_s6 + $0x38] sm:$0xff] }
 0x11e   :  { %v264_v43 = vpop.permute.xlu1 %263  ;;  %v262_v44 = vpop.permute.xlu0 %261  ;;  %v326_v45 = vadd.f32 %v2091_v36, %v294_v41 }
 0x11f   :  { %v279_v46 = vsel %vm273_vm1, %v262_v44, %v264_v43 }
 0x120   :  { %v295_v47 = vadd.f32 %v279_v46, %v190_v42  ;;  %v334_v6 = vmax.f32 %v326_v45, 0.0 }
 0x122   :  { %v163_v48 = vpop.permute.xlu1 %162  ;;  %v161_v49 = vpop.permute.xlu0 %160  ;;  %1574 = vmatprep.mubr.f32.mxu0 %v334_v6  ;;  %1618 = vmatprep.mubr.f32.mxu1 %v334_v6  ;;  %v327_v50 = vadd.f32 %v2089_v35, %v295_v47  ;;  %v2221_v6 = vld [vmem:[%s2420_s5 + $0x8] sm:$0xff] }
 0x123   :  { %v175_v8 = vsel %vm168_vm0, %v161_v49, %v163_v48  ;;  %v958_v48 = vld [vmem:[%s2422_s7 + $0x38] sm:$0x3f]  ;;  %v590_v49 = vld [vmem:[%s2420_s5 + $0x10] sm:$0xff] }
 0x124   :  { %v335_v51 = vmax.f32 %v327_v50, 0.0  ;;  %v191_v34 = vadd.f32 %v175_v8, %v2037_v12  ;;  %v957_v50 = vld [vmem:[%s2422_s7 + $0x30] sm:$0xff]  ;;  %v955_v8 = vld [vmem:[%s2422_s7 + $0x20] sm:$0xff] }
 0x126   :  { %v167_v52 = vpop.permute.xlu1 %166  ;;  %v165_v53 = vpop.permute.xlu0 %164  ;;  %1575 = vmatmul.mubr.f32.gmra.mxu0 %v335_v51  ;;  %1619 = vmatmul.mubr.f32.gmra.mxu1 %v335_v51  ;;  %v591_v51 = vld [vmem:[%s2420_s5 + $0x18] sm:$0xff] }
 0x127   :  { %v176_v55 = vsel %vm168_vm0, %v165_v53, %v167_v52  ;;  %v956_v52 = vld [vmem:[%s2422_s7 + $0x28] sm:$0xff]  ;;  %v592_v53 = vld [vmem:[%s2420_s5 + $0x20] sm:$0xff] }
 0x128   :  { %v192_v58 = vadd.f32 %v176_v55, %v2047_v16 }
 0x12a   :  { %v268_v36 = vpop.permute.xlu1 %267  ;;  %v266_v54 = vpop.permute.xlu0 %265 }
 0x12b   :  { %v280_v56 = vsel %vm273_vm1, %v266_v54, %v268_v36  ;;  %v594_v36 = vld [vmem:[%s2420_s5 + $0x30] sm:$0xff] }
 0x12c   :  { %v296_v57 = vadd.f32 %v280_v56, %v191_v34  ;;  %v593_v34 = vld [vmem:[%s2420_s5 + $0x28] sm:$0xff]  ;;  %v595_v56 = vld [vmem:[%s2420_s5 + $0x38] sm:$0xff] }
 0x12e   :  { %v272_v59 = vpop.permute.xlu1 %271  ;;  %v270_v35 = vpop.permute.xlu0 %269  ;;  %v328_v60 = vadd.f32 %v2095_v38, %v296_v57 }
 0x12f   :  { %v281_v61 = vsel %vm273_vm1, %v270_v35, %v272_v59 }
 0x130   :  { %v297_v62 = vadd.f32 %v281_v61, %v192_v58  ;;  %v336_v63 = vmax.f32 %v328_v60, 0.0 }
 0x132   :  { %1577 = vmatprep.mubr.f32.mxu0 %v336_v63  ;;  %1621 = vmatprep.mubr.f32.mxu1 %v336_v63  ;;  %v329_v12 = vadd.f32 %v2093_v37, %v297_v62  ;;  %v1164_v62 = vld [vmem:[%s2423_s8 + $0x38] sm:$0x3f]  ;;  %v1163_v63 = vld [vmem:[%s2423_s8 + $0x30] sm:$0xff] }
 0x134   :  { %v337_v0 = vmax.f32 %v329_v12, 0.0  ;;  %v1162_v12 = vld [vmem:[%s2423_s8 + $0x28] sm:$0xff] }
 0x136   :  { %1578 = vmatmul.mubr.f32.gmra.mxu0 %v337_v0  ;;  %1622 = vmatmul.mubr.f32.gmra.mxu1 %v337_v0  ;;  %v1161_v0 = vld [vmem:[%s2423_s8 + $0x20] sm:$0xff] }
 0x137   :  { %1648 = vmatprep.mubr.msk.f32.mxu0 %vm672_vm2, %v588_v14  ;;  %1684 = vmatprep.mubr.msk.f32.mxu1 %vm672_vm2, %v588_v14 }
 0x1c6   :  { %v1570_v1 = vpop.f32.mrf.mxu0  ;;  %v1614_v2 = vpop.f32.mrf.mxu1 }
 0x1c7   :  { %v2141_v13 = vmax.f32 %v1570_v1, %v1614_v2  ;;  %v954_v1 = vld [vmem:[%s2422_s7 + $0x18] sm:$0xff] }
 0x1c8   :  { %v420_v3 = vpop.f32.mrf.mxu0  ;;  %v541_v4 = vpop.f32.mrf.mxu1  ;;  %v1160_v2 = vld [vmem:[%s2423_s8 + $0x18] sm:$0xff] }
 0x1c9   :  { %v2145_v37 = vmax.f32 %v420_v3, %v541_v4  ;;  %v953_v3 = vld [vmem:[%s2422_s7 + $0x10] sm:$0xff] }
 0x1ca   :  { %v1159_v4 = vld [vmem:[%s2423_s8 + $0x10] sm:$0xff] }
 0x1d6   :  { %v1573_v16 = vpop.f32.mrf.mxu0  ;;  %v1617_v5 = vpop.f32.mrf.mxu1 }
 0x1d7   :  { %v2135_v7 = vmax.f32 %v1573_v16, %v1617_v5  ;;  %v952_v16 = vld [vmem:[%s2422_s7 + $0x8] sm:$0xff] }
 0x1d8   :  { %v430_v38 = vpop.f32.mrf.mxu0  ;;  %v551_v9 = vpop.f32.mrf.mxu1  ;;  %v1158_v5 = vld [vmem:[%s2423_s8 + $0x8] sm:$0xff] }
 0x1d9   :  { %v2137_v10 = vmax.f32 %v430_v38, %v551_v9  ;;  %626 = vrot.lane.b32.xlu0 %v2135_v7, %s1792_s19  ;;  %v1157_v38 = vld [vmem:[%s2423_s8] sm:$0xff] }
 0x1db   :  { %624 = vrot.lane.b32.xlu1 %v2137_v10, %s1792_s19 }
 0x1dd   :  { %622 = vrot.lane.b32.xlu0 %v2141_v13, %s1792_s19 }
 0x1df   :  { %620 = vrot.lane.b32.xlu1 %v2145_v37, %s1792_s19 }
 0x1e1   :  { %614 = vrot.lane.b32.xlu0 %v2135_v7, %s1791_s2 }
 0x1e3   :  { %612 = vrot.lane.b32.xlu1 %v2137_v10, %s1791_s2 }
 0x1e5   :  { %610 = vrot.lane.b32.xlu0 %v2141_v13, %s1791_s2 }
 0x1e6   :  { %v1576_v17 = vpop.f32.mrf.mxu0  ;;  %v1620_v18 = vpop.f32.mrf.mxu1 }
 0x1e7   :  { %608 = vrot.lane.b32.xlu1 %v2145_v37, %s1791_s2  ;;  %v2170_v26 = vmax.f32 %v1576_v17, %v1620_v18 }
 0x1e8   :  { %v440_v19 = vpop.f32.mrf.mxu0  ;;  %v561_v20 = vpop.f32.mrf.mxu1 }
 0x1e9   :  { %v2174_v27 = vmax.f32 %v440_v19, %v561_v20 }
 0x1f6   :  { %v1579_v21 = vpop.f32.mrf.mxu0  ;;  %v1623_v22 = vpop.f32.mrf.mxu1 }
 0x1f7   :  { %v2164_v11 = vmax.f32 %v1579_v21, %v1623_v22 }
 0x1f8   :  { %v450_v23 = vpop.f32.mrf.mxu0  ;;  %v571_v24 = vpop.f32.mrf.mxu1 }
 0x1f9   :  { %v2166_v25 = vmax.f32 %v450_v23, %v571_v24  ;;  %832 = vrot.lane.b32.xlu0 %v2164_v11, %s1792_s19 }
 0x1fb   :  { %830 = vrot.lane.b32.xlu1 %v2166_v25, %s1792_s19 }
 0x1fd   :  { %828 = vrot.lane.b32.xlu0 %v2170_v26, %s1792_s19 }
 0x1ff   :  { %826 = vrot.lane.b32.xlu1 %v2174_v27, %s1792_s19 }
 0x201   :  { %820 = vrot.lane.b32.xlu0 %v2164_v11, %s1791_s2 }
 0x203   :  { %818 = vrot.lane.b32.xlu1 %v2166_v25, %s1791_s2 }
 0x205   :  { %816 = vrot.lane.b32.xlu0 %v2170_v26, %s1791_s2 }
 0x207   :  { %814 = vrot.lane.b32.xlu1 %v2174_v27, %s1791_s2 }
 0x209   :  { %634 = vperm.xlu0 %1787, %v596_v28  }
 0x20b   :  { %639 = vperm.xlu1 %1786, %v597_v39  }
 0x20d   :  { %644 = vperm.xlu0 %1787, %v598_v15  }
 0x20f   :  { %649 = vperm.xlu1 %1786, %v599_v29  }
 0x211   :  { %654 = vperm.xlu0 %1787, %v600_v30  }
 0x213   :  { %659 = vperm.xlu1 %1786, %v601_v31  }
 0x215   :  { %664 = vperm.xlu0 %1787, %v602_v32  }
 0x217   :  { %669 = vperm.xlu1 %1786, %v603_v33  }
 0x24b   :  { %v627_v40 = vpop.permute.xlu0 %626 }
 0x24c   :  { %1624 = vmatprep.subr.mxu0 %v627_v40 }
 0x24d   :  { %1625 = vmatpush3.msra.mxu0 %v627_v40  ;;  %v625_v41 = vpop.permute.xlu1 %624 }
 0x24e   :  { %1626 = vmatprep.subr.mxu0 %v625_v41 }
 0x24f   :  { %v623_v42 = vpop.permute.xlu0 %622  ;;  %1627 = vmatpush3.msra.mxu0 %v625_v41 }
 0x250   :  { %1628 = vmatprep.subr.mxu0 %v623_v42 }
 0x251   :  { %1629 = vmatpush3.msra.mxu0 %v623_v42  ;;  %v621_v43 = vpop.permute.xlu1 %620 }
 0x252   :  { %1630 = vmatprep.subr.mxu0 %v621_v43 }
 0x253   :  { %v615_v44 = vpop.permute.xlu0 %614  ;;  %1631 = vmatpush3.msra.mxu0 %v621_v43 }
 0x254   :  { %1632 = vmatprep.subr.mxu0 %v615_v44 }
 0x255   :  { %1633 = vmatpush3.msra.mxu0 %v615_v44  ;;  %v613_v45 = vpop.permute.xlu1 %612 }
 0x256   :  { %1634 = vmatprep.subr.mxu0 %v613_v45 }
 0x257   :  { %v611_v46 = vpop.permute.xlu0 %610  ;;  %1635 = vmatpush3.msra.mxu0 %v613_v45 }
 0x258   :  { %1636 = vmatprep.subr.mxu0 %v611_v46 }
 0x259   :  { %1637 = vmatpush3.msra.mxu0 %v611_v46  ;;  %v609_v47 = vpop.permute.xlu1 %608 }
 0x25a   :  { %1638 = vmatprep.subr.mxu0 %v609_v47 }
 0x25b   :  { %1639 = vmatpush3.msra.mxu0 %v609_v47 }
 0x25c   :  { %1640 = vmatprep.subr.mxu0 %v2135_v7 }
 0x25d   :  { %1641 = vmatpush3.msra.mxu0 %v2135_v7  ;;  %v951_v7 = vld [vmem:[%s2422_s7] sm:$0xff] }
 0x25e   :  { %1642 = vmatprep.subr.mxu0 %v2137_v10 }
 0x25f   :  { %1643 = vmatpush3.msra.mxu0 %v2137_v10 }
 0x260   :  { %1644 = vmatprep.subr.mxu0 %v2141_v13 }
 0x261   :  { %1645 = vmatpush3.msra.mxu0 %v2141_v13 }
 0x262   :  { %1646 = vmatprep.subr.mxu0 %v2145_v37 }
 0x263   :  { %1647 = vmatpush3.msra.mxu0 %v2145_v37 }
 0x264   :  { %1649 = vmatmul.mubr.msk.f32.vlgmr.msra.gmra.mxu0 %vm672_vm2, %v2221_v6  ;;  %1696 = vmatprep.subr.msk.mxu0 %vm1008_vm3, %v958_v48 }
 0x265   :  { %1651 = vmatprep.mubr.msk.f32.mxu0 %vm672_vm2, %v590_v49  ;;  %1697 = vmatpush3.msk.msra.mxu0 %vm1008_vm3, %v958_v48 }
 0x266   :  { %1698 = vmatprep.subr.mxu0 %v957_v50 }
 0x267   :  { %1699 = vmatpush3.msra.mxu0 %v957_v50 }
 0x268   :  { %1652 = vmatmul.mubr.msk.f32.gmra.mxu0 %vm672_vm2, %v591_v51  ;;  %1700 = vmatprep.subr.mxu0 %v956_v52 }
 0x269   :  { %1654 = vmatprep.mubr.msk.f32.mxu0 %vm672_vm2, %v592_v53  ;;  %1701 = vmatpush3.msra.mxu0 %v956_v52 }
 0x26a   :  { %1702 = vmatprep.subr.mxu0 %v955_v8 }
 0x26b   :  { %v833_v54 = vpop.permute.xlu0 %832  ;;  %1703 = vmatpush3.msra.mxu0 %v955_v8 }
 0x26c   :  { %1655 = vmatmul.mubr.msk.f32.gmra.mxu0 %vm672_vm2, %v593_v34  ;;  %1660 = vmatprep.subr.mxu1 %v833_v54 }
 0x26d   :  { %1661 = vmatpush3.msra.mxu1 %v833_v54  ;;  %v831_v55 = vpop.permute.xlu1 %830  ;;  %1657 = vmatprep.mubr.msk.f32.mxu0 %vm672_vm2, %v594_v36 }
 0x26e   :  { %1662 = vmatprep.subr.mxu1 %v831_v55  ;;  %1704 = vmatprep.subr.mxu0 %v954_v1 }
 0x26f   :  { %v829_v57 = vpop.permute.xlu0 %828  ;;  %1663 = vmatpush3.msra.mxu1 %v831_v55  ;;  %1705 = vmatpush3.msra.mxu0 %v954_v1 }
 0x270   :  { %1658 = vmatmul.mubr.msk.f32.gmra.mxu0 %vm672_vm2, %v595_v56  ;;  %1664 = vmatprep.subr.mxu1 %v829_v57 }
 0x271   :  { %1665 = vmatpush3.msra.mxu1 %v829_v57  ;;  %v827_v58 = vpop.permute.xlu1 %826  ;;  %1706 = vmatprep.subr.mxu0 %v953_v3 }
 0x272   :  { %1666 = vmatprep.subr.mxu1 %v827_v58  ;;  %1707 = vmatpush3.msra.mxu0 %v953_v3 }
 0x273   :  { %v821_v59 = vpop.permute.xlu0 %820  ;;  %1667 = vmatpush3.msra.mxu1 %v827_v58  ;;  %1708 = vmatprep.subr.mxu0 %v952_v16 }
 0x274   :  { %1668 = vmatprep.subr.mxu1 %v821_v59  ;;  %1709 = vmatpush3.msra.mxu0 %v952_v16 }
 0x275   :  { %1669 = vmatpush3.msra.mxu1 %v821_v59  ;;  %v819_v35 = vpop.permute.xlu1 %818  ;;  %1710 = vmatprep.subr.mxu0 %v951_v7 }
 0x276   :  { %1670 = vmatprep.subr.mxu1 %v819_v35  ;;  %1711 = vmatpush3.msra.mxu0 %v951_v7 }
 0x277   :  { %v817_v60 = vpop.permute.xlu0 %816  ;;  %1671 = vmatpush3.msra.mxu1 %v819_v35 }
 0x278   :  { %1672 = vmatprep.subr.mxu1 %v817_v60 }
 0x279   :  { %1673 = vmatpush3.msra.mxu1 %v817_v60  ;;  %v815_v61 = vpop.permute.xlu1 %814 }
 0x27a   :  { %1674 = vmatprep.subr.mxu1 %v815_v61 }
 0x27b   :  { %1675 = vmatpush3.msra.mxu1 %v815_v61 }
 0x27c   :  { %1676 = vmatprep.subr.mxu1 %v2164_v11 }
 0x27d   :  { %1677 = vmatpush3.msra.mxu1 %v2164_v11 }
 0x27e   :  { %1678 = vmatprep.subr.mxu1 %v2166_v25 }
 0x27f   :  { %1679 = vmatpush3.msra.mxu1 %v2166_v25 }
 0x280   :  { %1680 = vmatprep.subr.mxu1 %v2170_v26 }
 0x281   :  { %1681 = vmatpush3.msra.mxu1 %v2170_v26 }
 0x282   :  { %1682 = vmatprep.subr.mxu1 %v2174_v27 }
 0x283   :  { %1683 = vmatpush3.msra.mxu1 %v2174_v27 }
 0x284   :  { %1685 = vmatmul.mubr.msk.f32.vlgmr.msra.gmra.mxu1 %vm672_vm2, %v2221_v6  ;;  %1736 = vmatprep.subr.msk.mxu1 %vm1008_vm3, %v1164_v62  ;;  %v635_v10 = vpop.permute.xlu0 %634 }
 0x285   :  { %1687 = vmatprep.mubr.msk.f32.mxu1 %vm672_vm2, %v590_v49  ;;  %1737 = vmatpush3.msk.msra.mxu1 %vm1008_vm3, %v1164_v62 }
 0x286   :  { %1738 = vmatprep.subr.mxu1 %v1163_v63  ;;  %v640_v9 = vpop.permute.xlu1 %639 }
 0x287   :  { %1739 = vmatpush3.msra.mxu1 %v1163_v63 }
 0x288   :  { %1688 = vmatmul.mubr.msk.f32.gmra.mxu1 %vm672_vm2, %v591_v51  ;;  %1740 = vmatprep.subr.mxu1 %v1162_v12  ;;  %v645_v14 = vpop.permute.xlu0 %644 }
 0x289   :  { %1690 = vmatprep.mubr.msk.f32.mxu1 %vm672_vm2, %v592_v53  ;;  %1741 = vmatpush3.msra.mxu1 %v1162_v12 }
 0x28a   :  { %1742 = vmatprep.subr.mxu1 %v1161_v0  ;;  %v650_v37 = vpop.permute.xlu1 %649 }
 0x28b   :  { %1743 = vmatpush3.msra.mxu1 %v1161_v0 }
 0x28c   :  { %1691 = vmatmul.mubr.msk.f32.gmra.mxu1 %vm672_vm2, %v593_v34  ;;  %1744 = vmatprep.subr.mxu1 %v1160_v2  ;;  %v655_v26 = vpop.permute.xlu0 %654 }
 0x28d   :  { %1693 = vmatprep.mubr.msk.f32.mxu1 %vm672_vm2, %v594_v36  ;;  %1745 = vmatpush3.msra.mxu1 %v1160_v2 }
 0x28e   :  { %1746 = vmatprep.subr.mxu1 %v1159_v4  ;;  %v660_v24 = vpop.permute.xlu1 %659 }
 0x28f   :  { %1747 = vmatpush3.msra.mxu1 %v1159_v4 }
 0x290   :  { %1694 = vmatmul.mubr.msk.f32.gmra.mxu1 %vm672_vm2, %v595_v56  ;;  %1748 = vmatprep.subr.mxu1 %v1158_v5  ;;  %v665_v40 = vpop.permute.xlu0 %664 }
 0x291   :  { %1749 = vmatpush3.msra.mxu1 %v1158_v5 }
 0x292   :  { %1750 = vmatprep.subr.mxu1 %v1157_v38  ;;  %v670_v32 = vpop.permute.xlu1 %669 }
 0x293   :  { %1751 = vmatpush3.msra.mxu1 %v1157_v38 }
 0x324   :  { %v1650_v13 = vpop.f32.mrf.mxu0 }
 0x325   :  { %v769_v17 = vadd.f32 %v1650_v13, %v640_v9 }
 0x326   :  { %v763_v18 = vpop.f32.mrf.mxu0 }
 0x327   :  { %v764_v19 = vadd.f32 %v763_v18, %v635_v10  ;;  %v803_v22 = vmax.f32 %v769_v17, 0.0 }
 0x328   :  { %v1653_v20 = vpop.f32.mrf.mxu0 }
 0x329   :  { %v802_v21 = vmax.f32 %v764_v19, 0.0  ;;  %v779_v11 = vadd.f32 %v1653_v20, %v650_v37 }
 0x32a   :  { %v773_v23 = vpop.f32.mrf.mxu0 }
 0x32b   :  { %v774_v25 = vadd.f32 %v773_v23, %v645_v14  ;;  %1712 = vmatprep.mubr.msk.f32.mxu0 %vm959_vm4, %v802_v21  ;;  %1752 = vmatprep.mubr.msk.f32.mxu1 %vm959_vm4, %v802_v21  ;;  %v805_v39 = vmax.f32 %v779_v11, 0.0 }
 0x32c   :  { %v1656_v27 = vpop.f32.mrf.mxu0  ;;  %1713 = vmatmul.mubr.msk.f32.vlgmr.msra.gmra.mxu0 %vm959_vm4, %v803_v22  ;;  %1753 = vmatmul.mubr.msk.f32.vlgmr.msra.gmra.mxu1 %vm959_vm4, %v803_v22 }
 0x32d   :  { %v804_v28 = vmax.f32 %v774_v25, 0.0  ;;  %v789_v15 = vadd.f32 %v1656_v27, %v660_v24 }
 0x32e   :  { %v783_v29 = vpop.f32.mrf.mxu0 }
 0x32f   :  { %v784_v30 = vadd.f32 %v783_v29, %v655_v26  ;;  %1715 = vmatprep.mubr.msk.f32.mxu0 %vm959_vm4, %v804_v28  ;;  %1755 = vmatprep.mubr.msk.f32.mxu1 %vm959_vm4, %v804_v28  ;;  %v807_v41 = vmax.f32 %v789_v15, 0.0 }
 0x330   :  { %v1659_v31 = vpop.f32.mrf.mxu0  ;;  %1716 = vmatmul.mubr.msk.f32.gmra.mxu0 %vm959_vm4, %v805_v39  ;;  %1756 = vmatmul.mubr.msk.f32.gmra.mxu1 %vm959_vm4, %v805_v39 }
 0x331   :  { %v806_v33 = vmax.f32 %v784_v30, 0.0  ;;  %v799_v42 = vadd.f32 %v1659_v31, %v670_v32 }
 0x332   :  { %v793_v43 = vpop.f32.mrf.mxu0 }
 0x333   :  { %v794_v44 = vadd.f32 %v793_v43, %v665_v40  ;;  %1718 = vmatprep.mubr.msk.f32.mxu0 %vm959_vm4, %v806_v33  ;;  %1758 = vmatprep.mubr.msk.f32.mxu1 %vm959_vm4, %v806_v33  ;;  %v809_v46 = vmax.f32 %v799_v42, 0.0 }
 0x334   :  { %1719 = vmatmul.mubr.msk.f32.gmra.mxu0 %vm959_vm4, %v807_v41  ;;  %1759 = vmatmul.mubr.msk.f32.gmra.mxu1 %vm959_vm4, %v807_v41 }
 0x335   :  { %v808_v45 = vmax.f32 %v794_v44, 0.0 }
 0x337   :  { %1721 = vmatprep.mubr.msk.f32.mxu0 %vm959_vm4, %v808_v45  ;;  %1761 = vmatprep.mubr.msk.f32.mxu1 %vm959_vm4, %v808_v45 }
 0x338   :  { %1722 = vmatmul.mubr.msk.f32.gmra.mxu0 %vm959_vm4, %v809_v46  ;;  %1762 = vmatmul.mubr.msk.f32.gmra.mxu1 %vm959_vm4, %v809_v46 }
 0x344   :  { %v1686_v47 = vpop.f32.mrf.mxu1 }
 0x345   :  { %v910_v6 = vadd.f32 %v1686_v47, %v640_v9 }
 0x346   :  { %v904_v48 = vpop.f32.mrf.mxu1 }
 0x347   :  { %v905_v49 = vadd.f32 %v904_v48, %v635_v10  ;;  %v944_v52 = vmax.f32 %v910_v6, 0.0 }
 0x348   :  { %v1689_v50 = vpop.f32.mrf.mxu1 }
 0x349   :  { %v943_v51 = vmax.f32 %v905_v49, 0.0  ;;  %v920_v53 = vadd.f32 %v1689_v50, %v650_v37 }
 0x34a   :  { %v914_v8 = vpop.f32.mrf.mxu1 }
 0x34b   :  { %v915_v34 = vadd.f32 %v914_v8, %v645_v14  ;;  %1724 = vmatprep.mubr.msk.f32.mxu0 %vm959_vm4, %v943_v51  ;;  %1764 = vmatprep.mubr.msk.f32.mxu1 %vm959_vm4, %v943_v51  ;;  %v946_v55 = vmax.f32 %v920_v53, 0.0 }
 0x34c   :  { %v1692_v36 = vpop.f32.mrf.mxu1  ;;  %1725 = vmatmul.mubr.msk.f32.gmra.mxu0 %vm959_vm4, %v944_v52  ;;  %1765 = vmatmul.mubr.msk.f32.gmra.mxu1 %vm959_vm4, %v944_v52 }
 0x34d   :  { %v945_v54 = vmax.f32 %v915_v34, 0.0  ;;  %v930_v56 = vadd.f32 %v1692_v36, %v660_v24 }
 0x34e   :  { %v924_v57 = vpop.f32.mrf.mxu1 }
 0x34f   :  { %v925_v58 = vadd.f32 %v924_v57, %v655_v26  ;;  %1727 = vmatprep.mubr.msk.f32.mxu0 %vm959_vm4, %v945_v54  ;;  %1767 = vmatprep.mubr.msk.f32.mxu1 %vm959_vm4, %v945_v54  ;;  %v948_v60 = vmax.f32 %v930_v56, 0.0 }
 0x350   :  { %v1695_v59 = vpop.f32.mrf.mxu1  ;;  %1728 = vmatmul.mubr.msk.f32.gmra.mxu0 %vm959_vm4, %v946_v55  ;;  %1768 = vmatmul.mubr.msk.f32.gmra.mxu1 %vm959_vm4, %v946_v55 }
 0x351   :  { %v947_v35 = vmax.f32 %v925_v58, 0.0  ;;  %v940_v61 = vadd.f32 %v1695_v59, %v670_v32 }
 0x352   :  { %v934_v62 = vpop.f32.mrf.mxu1 }
 0x353   :  { %v935_v63 = vadd.f32 %v934_v62, %v665_v40  ;;  %1730 = vmatprep.mubr.msk.f32.mxu0 %vm959_vm4, %v947_v35  ;;  %1770 = vmatprep.mubr.msk.f32.mxu1 %vm959_vm4, %v947_v35  ;;  %v950_v0 = vmax.f32 %v940_v61, 0.0 }
 0x354   :  { %1731 = vmatmul.mubr.msk.f32.gmra.mxu0 %vm959_vm4, %v948_v60  ;;  %1771 = vmatmul.mubr.msk.f32.gmra.mxu1 %vm959_vm4, %v948_v60 }
 0x355   :  { %v949_v12 = vmax.f32 %v935_v63, 0.0 }
 0x357   :  { %1733 = vmatprep.mubr.msk.f32.mxu0 %vm959_vm4, %v949_v12  ;;  %1773 = vmatprep.mubr.msk.f32.mxu1 %vm959_vm4, %v949_v12 }
 0x358   :  { %1734 = vmatmul.mubr.msk.f32.gmra.mxu0 %vm959_vm4, %v950_v0  ;;  %1774 = vmatmul.mubr.msk.f32.gmra.mxu1 %vm959_vm4, %v950_v0 }
 0x3ec   :  { %v1714_v1 = vpop.f32.mrf.mxu0  ;;  %v1754_v2 = vpop.f32.mrf.mxu1 }
 0x3ed   :  { %v1314_v3 = vmax.f32 %v1714_v1, %v1754_v2 }
 0x3ee   :  { %v1078_v4 = vpop.f32.mrf.mxu0  ;;  %v1234_v16 = vpop.f32.mrf.mxu1 }
 0x3ef   :  { %1331 = vst.msk [vmem:[%s2424_s9 + $0x8] sm:$0xff] %vm1329_vm5, %v1314_v3  ;;  %v1313_v5 = vmax.f32 %v1078_v4, %v1234_v16 }
 0x3f0   :  { %v1717_v7 = vpop.f32.mrf.mxu0  ;;  %v1757_v38 = vpop.f32.mrf.mxu1 }
 0x3f1   :  { %1330 = vst.msk [vmem:[%s2424_s9] sm:$0xff] %vm1329_vm5, %v1313_v5  ;;  %v1316_v9 = vmax.f32 %v1717_v7, %v1757_v38 }
 0x3f2   :  { %v1088_v10 = vpop.f32.mrf.mxu0  ;;  %v1244_v13 = vpop.f32.mrf.mxu1 }
 0x3f3   :  { %1333 = vst.msk [vmem:[%s2424_s9 + $0x18] sm:$0xff] %vm1329_vm5, %v1316_v9  ;;  %v1315_v37 = vmax.f32 %v1088_v10, %v1244_v13 }
 0x3f4   :  { %v1720_v14 = vpop.f32.mrf.mxu0  ;;  %v1760_v17 = vpop.f32.mrf.mxu1 }
 0x3f5   :  { %1332 = vst.msk [vmem:[%s2424_s9 + $0x10] sm:$0xff] %vm1329_vm5, %v1315_v37  ;;  %v1318_v18 = vmax.f32 %v1720_v14, %v1760_v17 }
 0x3f6   :  { %v1098_v19 = vpop.f32.mrf.mxu0  ;;  %v1254_v20 = vpop.f32.mrf.mxu1 }
 0x3f7   :  { %1335 = vst.msk [vmem:[%s2424_s9 + $0x28] sm:$0xff] %vm1329_vm5, %v1318_v18  ;;  %v1317_v21 = vmax.f32 %v1098_v19, %v1254_v20 }
 0x3f8   :  { %v1723_v22 = vpop.f32.mrf.mxu0  ;;  %v1763_v11 = vpop.f32.mrf.mxu1 }
 0x3f9   :  { %1334 = vst.msk [vmem:[%s2424_s9 + $0x20] sm:$0xff] %vm1329_vm5, %v1317_v21  ;;  %v1320_v23 = vmax.f32 %v1723_v22, %v1763_v11 }
 0x3fa   :  { %v1108_v24 = vpop.f32.mrf.mxu0  ;;  %v1264_v25 = vpop.f32.mrf.mxu1 }
 0x3fb   :  { %1337 = vst.msk [vmem:[%s2424_s9 + $0x38] sm:$0xff] %vm1329_vm5, %v1320_v23  ;;  %v1319_v26 = vmax.f32 %v1108_v24, %v1264_v25 }
 0x3fd   :  { %1336 = vst.msk [vmem:[%s2424_s9 + $0x30] sm:$0xff] %vm1329_vm5, %v1319_v26 }
 0x40c   :  { %v1726_v27 = vpop.f32.mrf.mxu0  ;;  %v1766_v28 = vpop.f32.mrf.mxu1 }
 0x40d   :  { %v1322_v39 = vmax.f32 %v1726_v27, %v1766_v28 }
 0x40e   :  { %v1118_v15 = vpop.f32.mrf.mxu0  ;;  %v1274_v29 = vpop.f32.mrf.mxu1 }
 0x40f   :  { %1339 = vst.msk [vmem:[%s2424_s9 + $0x48] sm:$0xff] %vm1329_vm5, %v1322_v39  ;;  %v1321_v30 = vmax.f32 %v1118_v15, %v1274_v29 }
 0x410   :  { %v1729_v31 = vpop.f32.mrf.mxu0  ;;  %v1769_v32 = vpop.f32.mrf.mxu1 }
 0x411   :  { %1338 = vst.msk [vmem:[%s2424_s9 + $0x40] sm:$0xff] %vm1329_vm5, %v1321_v30  ;;  %v1324_v33 = vmax.f32 %v1729_v31, %v1769_v32 }
 0x412   :  { %v1128_v40 = vpop.f32.mrf.mxu0  ;;  %v1284_v41 = vpop.f32.mrf.mxu1 }
 0x413   :  { %1341 = vst.msk [vmem:[%s2424_s9 + $0x58] sm:$0xff] %vm1329_vm5, %v1324_v33  ;;  %v1323_v42 = vmax.f32 %v1128_v40, %v1284_v41 }
 0x414   :  { %v1732_v43 = vpop.f32.mrf.mxu0  ;;  %v1772_v44 = vpop.f32.mrf.mxu1 }
 0x415   :  { %1340 = vst.msk [vmem:[%s2424_s9 + $0x50] sm:$0xff] %vm1329_vm5, %v1323_v42  ;;  %v1326_v45 = vmax.f32 %v1732_v43, %v1772_v44 }
 0x416   :  { %v1138_v46 = vpop.f32.mrf.mxu0  ;;  %v1294_v47 = vpop.f32.mrf.mxu1 }
 0x417   :  { %1343 = vst.msk [vmem:[%s2424_s9 + $0x68] sm:$0xff] %vm1329_vm5, %v1326_v45  ;;  %v1325_v6 = vmax.f32 %v1138_v46, %v1294_v47 }
 0x418   :  { %v1735_v48 = vpop.f32.mrf.mxu0  ;;  %v1775_v49 = vpop.f32.mrf.mxu1 }
 0x419   :  { %1342 = vst.msk [vmem:[%s2424_s9 + $0x60] sm:$0xff] %vm1329_vm5, %v1325_v6  ;;  %v1328_v50 = vmax.f32 %v1735_v48, %v1775_v49 }
 0x41a   :  { %v1148_v51 = vpop.f32.mrf.mxu0  ;;  %v1304_v52 = vpop.f32.mrf.mxu1 }
 0x41b   :  { %1345 = vst.msk [vmem:[%s2424_s9 + $0x78] sm:$0xff] %vm1329_vm5, %v1328_v50  ;;  %v1327_v53 = vmax.f32 %v1148_v51, %v1304_v52 }
 0x41d   :  { %1344 = vst.msk [vmem:[%s2424_s9 + $0x70] sm:$0xff] %vm1329_vm5, %v1327_v53 }

</bundles_post_ra>
